<compile_context>
chip_gen: v5e
topology: v5e:2x2
jax: 0.10.0
libtpu: 0.0.40
codegen_flags: <defaults>
</compile_context>

<pallas_src>
import jax
import jax.numpy as jnp
from jax.experimental import pallas as pl
from jax.experimental.pallas import tpu as pltpu


def _copy_kernel(x_ref, o_ref):
    # Identity copy of one VMEM tile.
    o_ref[...] = x_ref[...]


def _round_up(v: int, m: int) -> int:
    return ((v + m - 1) // m) * m


def _round_down(v: int, m: int) -> int:
    return (v // m) * m


def _vmem_params():
    """(max_tile_bytes, vmem_limit_bytes) derived from this chip's VMEM."""
    try:
        phys = int(pltpu.get_tpu_info().vmem_capacity_bytes)
    except Exception:
        phys = 64 << 20  # be conservative (v7x has 64 MiB physical per TC)
    # Leave headroom under physical VMEM: ~48 MiB on v7x, 64 MiB on v5e/v6e.
    vmem_limit = min((phys * 3) // 4, 64 << 20)
    # 2 input bufs + 2 output bufs (double-buffered) must fit the limit.
    max_tile_bytes = min(8 << 20, vmem_limit // 4)
    return max_tile_bytes, vmem_limit


def _flat_tiles(total: int, itemsize: int, max_tile_bytes: int):
    """Factor the flat contiguous buffer as (rows, L); pick a row-tile TR."""
    L = 128
    for cand in (8192, 4096, 2048, 1024, 512, 256, 128):
        if total % cand == 0 and 8 * cand * itemsize <= max_tile_bytes:
            L = cand
            break
    rows = total // L
    max_rows = max(8, _round_down(max_tile_bytes // (L * itemsize), 8))
    if rows <= 8:
        TR = rows                                   # full extent (legal for any rows)
    elif rows <= max_rows:
        # Whole buffer fits one tile: still split in two so v7x's 2nd TC gets work.
        TR = max(8, _round_up((rows + 1) // 2, 8))
    else:
        TR = max_rows
    return rows, L, TR


def _tiles_2d(B: int, F: int, itemsize: int, max_tile_bytes: int):
    """Fallback tiling when B*F is not a multiple of 128. Byte-capped on every branch."""
    if F * itemsize * min(B, 8) <= max_tile_bytes:
        TF = F                                      # full extent (legal for any F)
    else:
        cap_tf = max(128, _round_down(max_tile_bytes // (8 * itemsize), 128))
        TF = max(128, min(_round_down(F, 128), cap_tf))
    if B <= 8:
        TB = B                                      # full extent
    else:
        rows_cap = max(8, _round_down(max_tile_bytes // (TF * itemsize), 8))
        TB = max(8, min(rows_cap, _round_down(B, 8)))
    return TB, TF


def _pallas_identity_copy(x: jax.Array, *, donate: bool = False) -> jax.Array:
    """Tiled, lane-dense HBM->VMEM->HBM identity copy of a 2-D array."""
    B, F = x.shape
    itemsize = jnp.dtype(x.dtype).itemsize
    max_tile_bytes, vmem_limit = _vmem_params()
    total = B * F
    alias = {0: 0} if donate else {}

    # TODO(synk): when force_copy is only a materialization anchor, a pure
    # HBM->HBM DMA (memory_space=pl.ANY refs + pltpu.make_async_copy) would
    # skip the VMEM round-trip entirely.

    if total % 128 == 0:
        # Contiguous-slab tiling: each block is one linear HBM DMA, unmasked vst.
        rows, L, TR = _flat_tiles(total, itemsize, max_tile_bytes)
        flat = x.reshape(rows, L)                   # metadata-only view of the flat buffer
        out = pl.pallas_call(
            _copy_kernel,
            out_shape=jax.ShapeDtypeStruct((rows, L), x.dtype),
            grid=(pl.cdiv(rows, TR),),
            in_specs=[pl.BlockSpec((TR, L), lambda i: (i, 0))],
            out_specs=pl.BlockSpec((TR, L), lambda i: (i, 0)),
            compiler_params=pltpu.CompilerParams(
                dimension_semantics=("parallel",),
                vmem_limit_bytes=vmem_limit,
            ),
            cost_estimate=pl.CostEstimate(
                flops=0, transcendentals=0,
                bytes_accessed=2 * total * itemsize),
            input_output_aliases=alias,
        )(flat)
        return out.reshape(B, F)

    # Fallback: tile (B, F) directly; byte-capped, only edge tiles are masked.
    TB, TF = _tiles_2d(B, F, itemsize, max_tile_bytes)
    return pl.pallas_call(
        _copy_kernel,
        out_shape=jax.ShapeDtypeStruct((B, F), x.dtype),
        grid=(pl.cdiv(B, TB), pl.cdiv(F, TF)),
        in_specs=[pl.BlockSpec((TB, TF), lambda i, j: (i, j))],
        out_specs=pl.BlockSpec((TB, TF), lambda i, j: (i, j)),
        compiler_params=pltpu.CompilerParams(
            dimension_semantics=("parallel", "parallel"),
            vmem_limit_bytes=vmem_limit,
        ),
        cost_estimate=pl.CostEstimate(
            flops=0, transcendentals=0,
            bytes_accessed=2 * total * itemsize),
        input_output_aliases=alias,
    )(x)


def unflatten(x: jax.Array, block_size: int, *, force_copy: bool = False,
              donate: bool = False) -> jax.Array:
    """UnFlatten.forward: (B, F) -> (B, F // block_size**2, block_size, block_size).

    Default path is a pure metadata reshape (zero HBM traffic).  Set
    force_copy=True to route the data through the tiled Pallas identity copy;
    donate=True additionally aliases the copy's output onto its input buffer.
    """
    B, F = x.shape
    bs2 = block_size * block_size
    assert F % bs2 == 0, "feature dim must be divisible by block_size**2"
    C = F // bs2
    flat = _pallas_identity_copy(x, donate=donate) if force_copy else x
    # Metadata-only reshape (same element order as torch .view on contiguous data).
    return flat.reshape(B, C, block_size, block_size)


if __name__ == "__main__":
    key = jax.random.PRNGKey(0)

    # Shapes implied by the module: flattened (B, F) input with F = C * block**2.
    block_size = 4
    B, C = 2, 8
    F = C * block_size * block_size          # 128
    x = jax.random.normal(key, (B, F), dtype=jnp.float32)
    ref = x.reshape(B, C, block_size, block_size)   # == torch .view on contiguous data

    # Recommended path: no kernel, pure metadata reshape.
    out_fast = unflatten(x, block_size)
    jax.block_until_ready(out_fast)
    assert out_fast.shape == (B, C, block_size, block_size)
    assert out_fast.dtype == x.dtype
    assert jnp.array_equal(out_fast, ref)

    # Pallas copy path: flattened lane-dense slab tiling.
    out_copy = unflatten(x, block_size, force_copy=True)
    jax.block_until_ready(out_copy)
    assert out_copy.shape == ref.shape and out_copy.dtype == ref.dtype
    assert jnp.array_equal(out_copy, ref)

    # Pallas copy path with output aliased onto the input (input_output_aliases).
    out_alias = unflatten(x, block_size, force_copy=True, donate=True)
    jax.block_until_ready(out_alias)
    assert jnp.array_equal(out_alias, ref)

    # Fallback path: B*F not a multiple of 128 -> byte-capped 2-D tiling.
    x2 = jax.random.normal(jax.random.PRNGKey(0), (4, 180), dtype=jnp.float32)
    ref2 = x2.reshape(4, 45, 2, 2)
    out2 = unflatten(x2, 2, force_copy=True)
    jax.block_until_ready(out2)
    assert jnp.array_equal(out2, ref2)

    print("KERNEL_OK")
</pallas_src>

<mosaic_0001>
module attributes {stable_mosaic.version = 11 : i64} {
  func.func @_copy_kernel(%arg0: i32, %arg1: memref<1x256xf32, #tpu.memory_space<vmem>>, %arg2: memref<1x256xf32, #tpu.memory_space<vmem>>) attributes {dimension_semantics = [#tpu.dimension_semantics<parallel>], iteration_bounds = array<i64: 1>, scalar_prefetch = 0 : i64, scratch_operands = 0 : i64, tpu.core_type = #tpu.core_type<tc>, window_params = [{transform_indices = @transform_0, window_bounds = array<i64: 1, 256>}, {transform_indices = @transform_1, window_bounds = array<i64: 1, 256>}]} {
    %c0 = arith.constant 0 : index
    %c0_0 = arith.constant 0 : index
    %0 = vector.load %arg1[%c0, %c0_0] : memref<1x256xf32, #tpu.memory_space<vmem>>, vector<1x256xf32>
    %c0_1 = arith.constant 0 : index
    %c0_2 = arith.constant 0 : index
    %1 = vector.load %arg2[%c0_1, %c0_2] : memref<1x256xf32, #tpu.memory_space<vmem>>, vector<1x256xf32>
    tpu.vector_store %arg2[%c0_1, %c0_2], %0 {strides = array<i32>} : memref<1x256xf32, #tpu.memory_space<vmem>>, vector<1x256xf32>,
    return
  }
  func.func @transform_0(%arg0: i32) -> (i32, i32) {
    %c0_i32 = arith.constant 0 : i32
    %c0_i32_0 = arith.constant 0 : i32
    return %arg0, %c0_i32 : i32, i32
  }
  func.func @transform_1(%arg0: i32) -> (i32, i32) {
    %c0_i32 = arith.constant 0 : i32
    %c0_i32_0 = arith.constant 0 : i32
    return %arg0, %c0_i32 : i32, i32
  }
}

</mosaic_0001>

<bundles_post_ra>
// kernel: tpu_custom_call.1
= control target key start
LH: loop header
LB: loop body
LE: loop exit
PB: predicated region body
PF: predicated region fallthrough
CT: control target
= control target key end

     0   :  { %6 = vsyncpa [#allocation3], 0  ;;  %s118_s0 = inlined_call_operand.hbm [shape: f32[1,256], index: 0, kind: input, shape index: {}]   ;;  %s119_s1 = inlined_call_operand.hbm [shape: f32[1,256], index: 1, kind: output, shape index: {}]  }
   0x1   :  { %7 = vsyncpa [#allocation4], 0  ;;  %s13_s8 = sshll.u32 %s118_s0, 4  ;;  %s100_s9 = smov [#allocation2]   ;;  %s14_s8 = int_to_ptr.hbm [resolvable:$true] %s13_s8 }
   0x2   :  { %s15_s10 = sshll.u32 %s100_s9, 4  ;;  %s16_s10 = int_to_ptr.vmem [resolvable:$true] %s15_s10 }
   0x3   :  { %18 = dma.hbm_to_vmem [thread:$0]  %s14_s8, 32, %s16_s10, [#allocation3]  }
   0x4   :  { %96 = dma.done.wait [#allocation3], 32  }
   0x5   :  { %97 = vsyncadd [#allocation3], 4294967264  ;;  %v24_v0 = vlaneseq  ;;  %s101_s11 = smov [#allocation5]   ;;  %s36_s15 = sshll.u32 %s119_s1, 4  ;;  %v23_v1 = vld [vmem:[#allocation2] sm:$0x3]  ;;  %s37_s15 = int_to_ptr.hbm [resolvable:$true] %s36_s15 }
   0x6   :  { %s34_s12 = sshll.u32 %s101_s11, 4  ;;  %s35_s12 = int_to_ptr.vmem [resolvable:$true] %s34_s12 }
   0x7   :  { %vm26_vm0 = vcmp.lt.s32.totalorder %v24_v0, 256 }
   0x8   :  { %28 = vst.msk [vmem:[#allocation5] sm:$0x3] %vm26_vm0, %v23_v1 }
   0x9   :  { %39 = dma.vmem_to_hbm [thread:$0]  %s35_s12, 32, %s37_s15, [#allocation4]  }
   0xa   :  { %98 = dma.done.wait [#allocation4], 32  }
   0xb   :  { %99 = vsyncadd [#allocation4], 4294967264 }
   0xc   :  { %44 = vsyncpa [#allocation3], 1 }
   0xd   :  { %45 = vsyncpa [#allocation4], 1 }

</bundles_post_ra>
